<compile_context>
chip_gen: v5e
topology: v5e:2x2
jax: 0.10.0
libtpu: 0.0.40
codegen_flags: <defaults>
</compile_context>

<pallas_src>
import jax
import jax.numpy as jnp
from jax.experimental import pallas as pl
from jax.experimental.pallas import tpu as pltpu


# ---------------------------------------------------------------------------
# Kernels
# ---------------------------------------------------------------------------

def _base_matmul_kernel(x_ref, wo_ref, b_ref, o_ref, acc_ref):
    """out = x @ Wo + b, tiled over (i, j, k); k is the contraction axis."""
    k = pl.program_id(2)

    @pl.when(k == 0)
    def _():
        acc_ref[...] = jnp.zeros_like(acc_ref)

    acc_ref[...] += jnp.dot(x_ref[...], wo_ref[...],
                            preferred_element_type=jnp.float32)

    @pl.when(k == pl.num_programs(2) - 1)
    def _():
        out = acc_ref[...] + b_ref[...].astype(jnp.float32)
        o_ref[...] = out.astype(o_ref.dtype)


def _lora_fused_kernel(x_ref, wo_ref, b_ref, wd_ref, wu_ref, o_ref,
                       acc_ref, dacc_ref):
    """out = x @ Wo + b + (x @ Wd) @ (alpha * Wu), fused, tiled over (i, j, k).

    acc_ref  : (tm, tn)  f32 base accumulator (reset every j tile)
    dacc_ref : (tm, Rp)  f32 down-projection accumulator; built only at j == 0 and
               reused (persistent VMEM scratch) for every subsequent N tile of row i.
    """
    j = pl.program_id(1)
    k = pl.program_id(2)
    nk = pl.num_programs(2)

    @pl.when(k == 0)
    def _():
        acc_ref[...] = jnp.zeros_like(acc_ref)

    @pl.when(jnp.logical_and(j == 0, k == 0))
    def _():
        dacc_ref[...] = jnp.zeros_like(dacc_ref)

    x = x_ref[...]  # native dtype straight into the MXU
    acc_ref[...] += jnp.dot(x, wo_ref[...], preferred_element_type=jnp.float32)

    @pl.when(j == 0)
    def _():
        dacc_ref[...] += jnp.dot(x, wd_ref[...],
                                 preferred_element_type=jnp.float32)

    @pl.when(k == nk - 1)
    def _():
        lora = jnp.dot(dacc_ref[...].astype(wu_ref.dtype), wu_ref[...],
                       preferred_element_type=jnp.float32)
        out = acc_ref[...] + b_ref[...].astype(jnp.float32) + lora
        o_ref[...] = out.astype(o_ref.dtype)


# ---------------------------------------------------------------------------
# Wrapper
# ---------------------------------------------------------------------------

def _round_up(x, m):
    return ((x + m - 1) // m) * m


def _pad2d(a, rows, cols):
    r, c = a.shape
    if r == rows and c == cols:
        return a
    return jnp.pad(a, ((0, rows - r), (0, cols - c)))


def _lora_matmul_2d(x2d, w_orig, b_orig, w_down, w_up, alpha_eff, *,
                    tm=256, tn=512, tk=512, merge_weights=False):
    """x2d: (M, K); w_orig: (N, K); w_down: (R, K); w_up: (N, R) — PyTorch (out, in)."""
    x2d = jnp.asarray(x2d)
    dtype = x2d.dtype
    M, K = x2d.shape
    N = w_orig.shape[0]
    R = w_down.shape[0]

    alpha_eff = float(alpha_eff)
    with_lora = (alpha_eff != 0.0) and not merge_weights

    wo = jnp.asarray(w_orig, dtype=dtype)                       # (N, K)
    if merge_weights and alpha_eff != 0.0:
        # Inference fast path: one-time merge, then a single matmul+bias kernel.
        merged = jnp.asarray(w_up, jnp.float32) @ jnp.asarray(w_down, jnp.float32)
        wo = (wo.astype(jnp.float32) + alpha_eff * merged).astype(dtype)

    if b_orig is None:
        b_orig = jnp.zeros((N,), dtype)

    # ---- tile sizes & padded dims (lane-dense: N, R padded to multiples of 128) ----
    tm_eff = min(tm, _round_up(M, 8))
    Mp = _round_up(M, tm_eff)
    Npad = _round_up(N, 128)
    tn_eff = Npad if Npad <= tn else tn
    Npad = _round_up(Npad, tn_eff)
    tk_eff = K if K <= tk else tk
    Kp = _round_up(K, tk_eff)
    Rp = _round_up(R, 128)

    x_p = _pad2d(x2d, Mp, Kp)
    wo_t = _pad2d(wo.T, Kp, Npad)                               # (Kp, Npad)
    b_p = _pad2d(jnp.asarray(b_orig, dtype=dtype).reshape(1, N), 1, Npad)

    grid = (Mp // tm_eff, Npad // tn_eff, Kp // tk_eff)

    x_spec = pl.BlockSpec((tm_eff, tk_eff), lambda i, j, k: (i, k))
    wo_spec = pl.BlockSpec((tk_eff, tn_eff), lambda i, j, k: (k, j))
    b_spec = pl.BlockSpec((1, tn_eff), lambda i, j, k: (0, j))
    out_spec = pl.BlockSpec((tm_eff, tn_eff), lambda i, j, k: (i, j))
    out_shape = jax.ShapeDtypeStruct((Mp, Npad), dtype)
    vmem_limit = 48 * 1024 * 1024   # explicit, safe on v5e/v6e/v7x

    if with_lora:
        # Fold alpha_eff (and drop multiplier) into Wu; zero-pad rank to 128 lanes.
        wd_t = _pad2d(jnp.asarray(w_down, dtype=dtype).T, Kp, Rp)                 # (Kp, Rp)
        wu_scaled = (alpha_eff * jnp.asarray(w_up, jnp.float32)).astype(dtype)
        wu_t = _pad2d(wu_scaled.T, Rp, Npad)                                      # (Rp, Npad)

        out = pl.pallas_call(
            _lora_fused_kernel,
            out_shape=out_shape,
            grid_spec=pltpu.PrefetchScalarGridSpec(
                num_scalar_prefetch=0,
                grid=grid,
                in_specs=[
                    x_spec, wo_spec, b_spec,
                    pl.BlockSpec((tk_eff, Rp), lambda i, j, k: (k, 0)),   # LoRA down
                    pl.BlockSpec((Rp, tn_eff), lambda i, j, k: (0, j)),   # LoRA up (scaled)
                ],
                out_specs=out_spec,
                scratch_shapes=[
                    pltpu.VMEM((tm_eff, tn_eff), jnp.float32),   # base accumulator
                    pltpu.VMEM((tm_eff, Rp), jnp.float32),       # down-proj accumulator
                ]),
            compiler_params=pltpu.CompilerParams(
                dimension_semantics=("parallel", "arbitrary", "arbitrary"),
                vmem_limit_bytes=vmem_limit),
        )(x_p, wo_t, b_p, wd_t, wu_t)
    else:
        # alpha_eff == 0 (drop) or merged weights: base-only kernel, LoRA matmuls skipped.
        out = pl.pallas_call(
            _base_matmul_kernel,
            out_shape=out_shape,
            grid_spec=pltpu.PrefetchScalarGridSpec(
                num_scalar_prefetch=0,
                grid=grid,
                in_specs=[x_spec, wo_spec, b_spec],
                out_specs=out_spec,
                scratch_shapes=[pltpu.VMEM((tm_eff, tn_eff), jnp.float32)]),
            compiler_params=pltpu.CompilerParams(
                dimension_semantics=("parallel", "parallel", "arbitrary"),
                vmem_limit_bytes=vmem_limit),
        )(x_p, wo_t, b_p)

    return out[:M, :N]


def lora_linear_forward(x, w_orig, b_orig, w_down, w_up, alpha=1.0,
                        enable_drop=False, training=False, merge_weights=False,
                        **tiles):
    """Linear case. x: (..., in_features)."""
    drop_mul = 0.0 if (enable_drop and training) else 1.0
    lead = x.shape[:-1]
    K = x.shape[-1]
    x2d = x.reshape(-1, K)
    out2d = _lora_matmul_2d(x2d, w_orig, b_orig, w_down, w_up,
                            drop_mul * float(alpha),
                            merge_weights=merge_weights, **tiles)
    return out2d.reshape(*lead, w_orig.shape[0])


def lora_conv1x1_forward(x_nchw, w_orig, b_orig, w_down, w_up, alpha=1.0,
                         enable_drop=False, training=False, merge_weights=False,
                         **tiles):
    """Conv2d(1x1) case. x: NCHW; conv weights (out, in, 1, 1)."""
    # TODO(synk): only stride-1, unpadded 1x1 original convs are lowered here; a general
    # Conv2d original (k>1, stride, padding, dilation) would need an im2col/conv kernel.
    drop_mul = 0.0 if (enable_drop and training) else 1.0
    n, c, h, w = x_nchw.shape
    x2d = jnp.transpose(x_nchw, (0, 2, 3, 1)).reshape(-1, c)     # (N*H*W, C_in)
    c_out = w_orig.shape[0]
    wo = w_orig.reshape(c_out, c)
    wd = w_down.reshape(w_down.shape[0], c)
    wu = w_up.reshape(c_out, w_down.shape[0])
    out2d = _lora_matmul_2d(x2d, wo, b_orig, wd, wu, drop_mul * float(alpha),
                            merge_weights=merge_weights, **tiles)
    return jnp.transpose(out2d.reshape(n, h, w, c_out), (0, 3, 1, 2))


# ---------------------------------------------------------------------------
# Reference + tests
# ---------------------------------------------------------------------------

def _ref_2d(x2d, w_orig, b_orig, w_down, w_up, alpha_eff):
    base = x2d @ w_orig.T + b_orig[None, :]
    lora = (x2d @ w_down.T) @ w_up.T
    return base + alpha_eff * lora


def _check(got, want, atol, rtol, msg):
    assert got.shape == want.shape, msg
    assert jnp.allclose(got, want, atol=atol, rtol=rtol), msg


if __name__ == "__main__":
    key = jax.random.PRNGKey(0)
    rank = 4

    # ----- Conv2d(1x1): original Conv2d(4 -> 8), x NCHW = (2, 4, 16, 16) -----
    kc1, kc2, kc3, kc4, kl1, kl2, kl3, kl4, kt1, kt2, kt3, kt4 = jax.random.split(key, 12)
    n, c_in, c_out, h, w = 2, 4, 8, 16, 16
    alpha = 1.0
    x_conv = jax.random.normal(kc1, (n, c_in, h, w), dtype=jnp.float32)
    w_conv_orig = jax.random.normal(kc2, (c_out, c_in, 1, 1), dtype=jnp.float32) * 0.1
    b_conv_orig = jax.random.normal(kc3, (c_out,), dtype=jnp.float32) * 0.1
    # Module init is down~N(0,1/rank), up=0; use nonzero "trained" up to exercise the branch.
    w_conv_down = jax.random.normal(kc1, (rank, c_in, 1, 1), dtype=jnp.float32) * (1.0 / rank)
    w_conv_up = jax.random.normal(kc4, (c_out, rank, 1, 1), dtype=jnp.float32) * 0.1

    out_conv = jax.block_until_ready(
        lora_conv1x1_forward(x_conv, w_conv_orig, b_conv_orig,
                             w_conv_down, w_conv_up, alpha))
    x2d = jnp.transpose(x_conv, (0, 2, 3, 1)).reshape(-1, c_in)
    ref = _ref_2d(x2d, w_conv_orig.reshape(c_out, c_in), b_conv_orig,
                  w_conv_down.reshape(rank, c_in), w_conv_up.reshape(c_out, rank), alpha)
    ref = jnp.transpose(ref.reshape(n, h, w, c_out), (0, 3, 1, 2))
    _check(out_conv, ref, 1e-4, 1e-4, "conv1x1 mismatch")

    # ----- Linear: original Linear(32 -> 64), x = (2, 8, 32), alpha = 0.75 -----
    b_sz, seq, d_in, d_out = 2, 8, 32, 64
    alpha_l = 0.75
    x_lin = jax.random.normal(kl1, (b_sz, seq, d_in), dtype=jnp.float32)
    w_lin_orig = jax.random.normal(kl2, (d_out, d_in), dtype=jnp.float32) * 0.1
    b_lin_orig = jax.random.normal(kl3, (d_out,), dtype=jnp.float32) * 0.1
    w_lin_down = jax.random.normal(kl1, (rank, d_in), dtype=jnp.float32) * (1.0 / rank)
    w_lin_up = jax.random.normal(kl4, (d_out, rank), dtype=jnp.float32) * 0.1

    ref_lin = _ref_2d(x_lin.reshape(-1, d_in), w_lin_orig, b_lin_orig,
                      w_lin_down, w_lin_up, alpha_l).reshape(b_sz, seq, d_out)

    out_lin = jax.block_until_ready(
        lora_linear_forward(x_lin, w_lin_orig, b_lin_orig,
                            w_lin_down, w_lin_up, alpha_l))
    _check(out_lin, ref_lin, 1e-4, 1e-4, "linear mismatch")

    # merged-weight inference fast path (single matmul kernel)
    out_merged = jax.block_until_ready(
        lora_linear_forward(x_lin, w_lin_orig, b_lin_orig,
                            w_lin_down, w_lin_up, alpha_l, merge_weights=True))
    _check(out_merged, ref_lin, 1e-4, 1e-4, "merged-weight mismatch")

    # dropout path (enable_drop & training -> whole LoRA branch dropped, base-only kernel)
    out_drop = jax.block_until_ready(
        lora_linear_forward(x_lin, w_lin_orig, b_lin_orig,
                            w_lin_down, w_lin_up, alpha_l,
                            enable_drop=True, training=True))
    ref_drop = (x_lin.reshape(-1, d_in) @ w_lin_orig.T
                + b_lin_orig[None, :]).reshape(b_sz, seq, d_out)
    _check(out_drop, ref_drop, 1e-4, 1e-4, "drop path mismatch")

    # ----- Tiling stress: ragged dims + small tiles to force a (3, 2, 3) grid -----
    tb, ts, t_in, t_out = 4, 80, 300, 200
    alpha_t = 1.25
    x_t = jax.random.normal(kt1, (tb, ts, t_in), dtype=jnp.float32)
    w_t_orig = jax.random.normal(kt2, (t_out, t_in), dtype=jnp.float32) * 0.05
    b_t_orig = jax.random.normal(kt3, (t_out,), dtype=jnp.float32) * 0.05
    w_t_down = jax.random.normal(kt1, (rank, t_in), dtype=jnp.float32) * (1.0 / rank)
    w_t_up = jax.random.normal(kt4, (t_out, rank), dtype=jnp.float32) * 0.05

    out_t = jax.block_until_ready(
        lora_linear_forward(x_t, w_t_orig, b_t_orig, w_t_down, w_t_up, alpha_t,
                            tm=128, tn=128, tk=128))
    ref_t = _ref_2d(x_t.reshape(-1, t_in), w_t_orig, b_t_orig,
                    w_t_down, w_t_up, alpha_t).reshape(tb, ts, t_out)
    _check(out_t, ref_t, 5e-4, 5e-4, "tiled (multi-block) mismatch")

    print("KERNEL_OK")
</pallas_src>

<mosaic_0001>
module attributes {stable_mosaic.version = 11 : i64} {
  func.func @_lora_fused_kernel(%arg0: i32, %arg1: i32, %arg2: i32, %arg3: memref<256x4xf32, #tpu.memory_space<vmem>>, %arg4: memref<4x128xf32, #tpu.memory_space<vmem>>, %arg5: memref<1x128xf32, #tpu.memory_space<vmem>>, %arg6: memref<4x128xf32, #tpu.memory_space<vmem>>, %arg7: memref<128x128xf32, #tpu.memory_space<vmem>>, %arg8: memref<256x128xf32, #tpu.memory_space<vmem>>, %arg9: memref<256x128xf32, #tpu.memory_space<vmem>>, %arg10: memref<256x128xf32, #tpu.memory_space<vmem>>) attributes {dimension_semantics = [#tpu.dimension_semantics<parallel>, #tpu.dimension_semantics<arbitrary>, #tpu.dimension_semantics<arbitrary>], iteration_bounds = array<i64: 2, 1, 1>, scalar_prefetch = 0 : i64, scratch_operands = 2 : i64, tpu.core_type = #tpu.core_type<tc>, window_params = [{transform_indices = @transform_0, window_bounds = array<i64: 256, 4>}, {transform_indices = @transform_1, window_bounds = array<i64: 4, 128>}, {transform_indices = @transform_2, window_bounds = array<i64: 1, 128>}, {transform_indices = @transform_3, window_bounds = array<i64: 4, 128>}, {transform_indices = @transform_4, window_bounds = array<i64: 128, 128>}, {transform_indices = @transform_5, window_bounds = array<i64: 256, 128>}]} {
    %c0_i32 = arith.constant 0 : i32
    %0 = arith.cmpi eq, %arg2, %c0_i32 : i32
    %1 = arith.extui %0 : i1 to i32
    %c0_i32_0 = arith.constant 0 : i32
    %2 = arith.cmpi ne, %1, %c0_i32_0 : i32
    scf.if %2 {
      %cst_15 = arith.constant 0.000000e+00 : f32
      %20 = vector.broadcast %cst_15 : f32 to vector<256x128xf32>
      %c0_16 = arith.constant 0 : index
      %c0_17 = arith.constant 0 : index
      %21 = vector.load %arg9[%c0_16, %c0_17] : memref<256x128xf32, #tpu.memory_space<vmem>>, vector<256x128xf32>
      tpu.vector_store %arg9[%c0_16, %c0_17], %20 {strides = array<i32>} : memref<256x128xf32, #tpu.memory_space<vmem>>, vector<256x128xf32>,
    } else {
    }
    %c0_i32_1 = arith.constant 0 : i32
    %3 = arith.cmpi eq, %arg1, %c0_i32_1 : i32
    %c0_i32_2 = arith.constant 0 : i32
    %4 = arith.cmpi eq, %arg2, %c0_i32_2 : i32
    %5 = arith.andi %3, %4 : i1
    %6 = arith.extui %5 : i1 to i32
    %c0_i32_3 = arith.constant 0 : i32
    %7 = arith.cmpi ne, %6, %c0_i32_3 : i32
    scf.if %7 {
      %cst_15 = arith.constant 0.000000e+00 : f32
      %20 = vector.broadcast %cst_15 : f32 to vector<256x128xf32>
      %c0_16 = arith.constant 0 : index
      %c0_17 = arith.constant 0 : index
      %21 = vector.load %arg10[%c0_16, %c0_17] : memref<256x128xf32, #tpu.memory_space<vmem>>, vector<256x128xf32>
      tpu.vector_store %arg10[%c0_16, %c0_17], %20 {strides = array<i32>} : memref<256x128xf32, #tpu.memory_space<vmem>>, vector<256x128xf32>,
    } else {
    }
    %c0 = arith.constant 0 : index
    %c0_4 = arith.constant 0 : index
    %8 = vector.load %arg3[%c0, %c0_4] : memref<256x4xf32, #tpu.memory_space<vmem>>, vector<256x4xf32>
    %c0_5 = arith.constant 0 : index
    %c0_6 = arith.constant 0 : index
    %9 = vector.load %arg9[%c0_5, %c0_6] : memref<256x128xf32, #tpu.memory_space<vmem>>, vector<256x128xf32>
    %c0_7 = arith.constant 0 : index
    %c0_8 = arith.constant 0 : index
    %10 = vector.load %arg4[%c0_7, %c0_8] : memref<4x128xf32, #tpu.memory_space<vmem>>, vector<4x128xf32>
    %cst = arith.constant dense<0.000000e+00> : vector<256x128xf32>
    %11 = tpu.matmul %8, %10, %cst {dimension_numbers = #tpu.dot_dimension_numbers<[1], [0], [0], [1], [0, 0, 1, 1], [], []>} : vector<256x4xf32>, vector<4x128xf32>, vector<256x128xf32> -> vector<256x128xf32>
    %12 = arith.addf %9, %11 : vector<256x128xf32>
    %c0_9 = arith.constant 0 : index
    %c0_10 = arith.constant 0 : index
    %13 = vector.load %arg9[%c0_9, %c0_10] : memref<256x128xf32, #tpu.memory_space<vmem>>, vector<256x128xf32>
    tpu.vector_store %arg9[%c0_9, %c0_10], %12 {strides = array<i32>} : memref<256x128xf32, #tpu.memory_space<vmem>>, vector<256x128xf32>,
    %c0_i32_11 = arith.constant 0 : i32
    %14 = arith.cmpi eq, %arg1, %c0_i32_11 : i32
    %15 = arith.extui %14 : i1 to i32
    %c0_i32_12 = arith.constant 0 : i32
    %16 = arith.cmpi ne, %15, %c0_i32_12 : i32
    scf.if %16 {
      %c0_15 = arith.constant 0 : index
      %c0_16 = arith.constant 0 : index
      %20 = vector.load %arg10[%c0_15, %c0_16] : memref<256x128xf32, #tpu.memory_space<vmem>>, vector<256x128xf32>
      %c0_17 = arith.constant 0 : index
      %c0_18 = arith.constant 0 : index
      %21 = vector.load %arg6[%c0_17, %c0_18] : memref<4x128xf32, #tpu.memory_space<vmem>>, vector<4x128xf32>
      %cst_19 = arith.constant dense<0.000000e+00> : vector<256x128xf32>
      %22 = tpu.matmul %8, %21, %cst_19 {dimension_numbers = #tpu.dot_dimension_numbers<[1], [0], [0], [1], [0, 0, 1, 1], [], []>} : vector<256x4xf32>, vector<4x128xf32>, vector<256x128xf32> -> vector<256x128xf32>
      %23 = arith.addf %20, %22 : vector<256x128xf32>
      %c0_20 = arith.constant 0 : index
      %c0_21 = arith.constant 0 : index
      %24 = vector.load %arg10[%c0_20, %c0_21] : memref<256x128xf32, #tpu.memory_space<vmem>>, vector<256x128xf32>
      tpu.vector_store %arg10[%c0_20, %c0_21], %23 {strides = array<i32>} : memref<256x128xf32, #tpu.memory_space<vmem>>, vector<256x128xf32>,
    } else {
    }
    %c0_i32_13 = arith.constant 0 : i32
    %17 = arith.cmpi eq, %arg2, %c0_i32_13 : i32
    %18 = arith.extui %17 : i1 to i32
    %c0_i32_14 = arith.constant 0 : i32
    %19 = arith.cmpi ne, %18, %c0_i32_14 : i32
    scf.if %19 {
      %c0_15 = arith.constant 0 : index
      %c0_16 = arith.constant 0 : index
      %20 = vector.load %arg10[%c0_15, %c0_16] : memref<256x128xf32, #tpu.memory_space<vmem>>, vector<256x128xf32>
      %c0_17 = arith.constant 0 : index
      %c0_18 = arith.constant 0 : index
      %21 = vector.load %arg7[%c0_17, %c0_18] : memref<128x128xf32, #tpu.memory_space<vmem>>, vector<128x128xf32>
      %cst_19 = arith.constant dense<0.000000e+00> : vector<256x128xf32>
      %22 = tpu.matmul %20, %21, %cst_19 {dimension_numbers = #tpu.dot_dimension_numbers<[1], [0], [0], [1], [0, 0, 1, 1], [], []>} : vector<256x128xf32>, vector<128x128xf32>, vector<256x128xf32> -> vector<256x128xf32>
      %c0_20 = arith.constant 0 : index
      %c0_21 = arith.constant 0 : index
      %23 = vector.load %arg9[%c0_20, %c0_21] : memref<256x128xf32, #tpu.memory_space<vmem>>, vector<256x128xf32>
      %c0_22 = arith.constant 0 : index
      %c0_23 = arith.constant 0 : index
      %24 = vector.load %arg5[%c0_22, %c0_23] : memref<1x128xf32, #tpu.memory_space<vmem>>, vector<1x128xf32>
      %25 = vector.broadcast %24 : vector<1x128xf32> to vector<256x128xf32>
      %26 = arith.addf %23, %25 : vector<256x128xf32>
      %27 = arith.addf %26, %22 : vector<256x128xf32>
      %c0_24 = arith.constant 0 : index
      %c0_25 = arith.constant 0 : index
      %28 = vector.load %arg8[%c0_24, %c0_25] : memref<256x128xf32, #tpu.memory_space<vmem>>, vector<256x128xf32>
      tpu.vector_store %arg8[%c0_24, %c0_25], %27 {strides = array<i32>} : memref<256x128xf32, #tpu.memory_space<vmem>>, vector<256x128xf32>,
    } else {
    }
    return
  }
  func.func @transform_0(%arg0: i32, %arg1: i32, %arg2: i32) -> (i32, i32) {
    %c0_i32 = arith.constant 0 : i32
    return %arg0, %arg2 : i32, i32
  }
  func.func @transform_1(%arg0: i32, %arg1: i32, %arg2: i32) -> (i32, i32) {
    %c0_i32 = arith.constant 0 : i32
    return %arg2, %arg1 : i32, i32
  }
  func.func @transform_2(%arg0: i32, %arg1: i32, %arg2: i32) -> (i32, i32) {
    %c0_i32 = arith.constant 0 : i32
    %c0_i32_0 = arith.constant 0 : i32
    return %c0_i32, %arg1 : i32, i32
  }
  func.func @transform_3(%arg0: i32, %arg1: i32, %arg2: i32) -> (i32, i32) {
    %c0_i32 = arith.constant 0 : i32
    %c0_i32_0 = arith.constant 0 : i32
    return %arg2, %c0_i32 : i32, i32
  }
  func.func @transform_4(%arg0: i32, %arg1: i32, %arg2: i32) -> (i32, i32) {
    %c0_i32 = arith.constant 0 : i32
    %c0_i32_0 = arith.constant 0 : i32
    return %c0_i32, %arg1 : i32, i32
  }
  func.func @transform_5(%arg0: i32, %arg1: i32, %arg2: i32) -> (i32, i32) {
    %c0_i32 = arith.constant 0 : i32
    return %arg0, %arg1 : i32, i32
  }
}

</mosaic_0001>

<bundles_post_ra>
// kernel: tpu_custom_call.1
= control target key start
LH: loop header
LB: loop body
LE: loop exit
PB: predicated region body
PF: predicated region fallthrough
CT: control target
= control target key end

     0   :  { %10 = vsyncpa [#allocation5], 0  ;;  %s2138_s0 = inlined_call_operand.vmem [shape: f32[512,4], index: 0, kind: input, shape index: {}]   ;;  %s2139_s1 = inlined_call_operand.vmem [shape: f32[4,128], index: 1, kind: input, shape index: {}]   ;;  %s2140_s2 = inlined_call_operand.vmem [shape: f32[1,128], index: 2, kind: input, shape index: {}]   ;;  %s2141_s3 = inlined_call_operand.vmem [shape: f32[4,128], index: 3, kind: input, shape index: {}]   ;;  %s2142_s4 = inlined_call_operand.vmem [shape: f32[128,128], index: 4, kind: input, shape index: {}]   ;;  %s2143_s5 = inlined_call_operand.hbm [shape: f32[512,128], index: 5, kind: output, shape index: {}]  }
   0x1   :  { %12 = vsyncpa [#allocation5 + $0x1], 0  ;;  %s1689_s18 = smov 0   ;;  %s1691_s19 = smov 0  }
   0x2   :  { %s1693_s20 = smov 0   ;;  %s1695_s21 = smov 0  }
   0x3   :  { %s1697_s22 = smov 0   ;;  %s1699_s23 = smov 0  }
   0x4 LB: > { %s1417_s24 = sadd.s32 4294967295, %s1655_s23   ;;  %s1418_s25 = sadd.s32 4294967294, %s1655_s23   ;;  %s1655_s23 = sphi %s1699_s23, %s18_s23   ;;  %s1651_s22 = sphi %s1697_s22, %s2150_s22   ;;  %s1647_s21 = sphi %s1695_s21, %s2149_s21   ;;  %s1643_s20 = sphi %s1693_s20, %s2148_s20   ;;  %s1639_s19 = sphi %s1691_s19, %s2147_s19   ;;  %s1635_s18 = sphi %s1689_s18, %s2146_s18  }
   0x5   : > { %s37_s26 = sadd.s32 1, %s1651_s22  ;;  %s180_s27 = sadd.s32 1, %s1643_s20 }
   0x6   : > { %p39_p0 = scmp.ge.s32.totalorder %s37_s26, 2  ;;  %p190_p1 = scmp.ne.s32.totalorder %s1643_s20, %s1639_s19 }
   0x7   : > { %p191_p2 = scmp.eq.s32.totalorder %s1417_s24, 1  ;;  %p196_p3 = scmp.ne.s32.totalorder %s1639_s19, %s1635_s18 }
   0x8   : > { %s2152_s26 = smov (%p39_p0, %s37_s26), 0  ;;  %p197_p5 = scmp.eq.s32.totalorder %s1418_s25, 1 }
   0x9   : > { %p1729_p4 = por %p191_p2, %p190_p1  ;;  %s175_s29 = ssub.s32 %s1651_s22, %s2152_s26 }
   0xa   : > { %p1425_p6 = scmp.ge.s32.totalorder %s1655_s23, 1  ;;  %p178_p7 = scmp.eq.s32.totalorder %s175_s29, 0 }
   0xb   : > { %p1736_p8 = por %p197_p5, %p196_p3  ;;  %p257_p9 = scmp.lt.s32.totalorder %s1655_s23, 3 }
   0xc   : > { %s1742_s6 = scalar_select %p178_p7, %s1643_s20, %s180_s27  }
   0xd   : > { %p258_p10 = pnand %p1425_p6, %p257_p9 }
   0xe   : > { %s1427_s9 = sshll.u32 (!%p258_p10), %s1647_s21, 5  ;;  %s303_s29 = sand.u32 (!%p258_p10), 1, %s1639_s19  }
   0xf   : > { %261 = sbr.rel (%p258_p10) target bundleno = 536 (0x218), region = 40  ;;  %p307_p11 = scmp.lt.s32.totalorder (!%p258_p10), %s1427_s9, 63 }
  0x10   : > { %s1426_s7 = sshll.u32 (!%p258_p10), %s303_s29, 8 }
  0x11   : > { %s2009_s8 = scalar_lea.vmem (!%p258_p10), [#allocation4], %s1426_s7 }
  0x12   : > { %s1276_s14 = sshll.u32 (!%p258_p10), %s2009_s8, 4  ;;  %s1277_s14 = int_to_ptr.vmem [resolvable:$true] %s1276_s14 }
  0x14   : > { %vm569_vm0 = vcmask 1043456   ;;  %v1747_v0 = vld [vmem:[%s2141_s3] sm:$0xf]  ;;  %s2154_s9 = smov (!%p307_p11, %s1427_s9), 63  ;;  %vm472_vm1 = vcmask 31744   ;;  %v1016_v9 = vld [vmem:[%s2142_s4 + $0x78] sm:$0xff] }
  0x15   : > { %1462 = vmatpush.msk.msra.mxu1 %vm569_vm0, %v1747_v0  ;;  %s1428_s10 = sshll.u32 %s2154_s9, 3  ;;  %1017 = vmatpush.msra.mxu2 %v1016_v9  ;;  %v1015_v11 = vld [vmem:[%s2142_s4 + $0x70] sm:$0xff]  ;;  %v1014_v12 = vld [vmem:[%s2142_s4 + $0x68] sm:$0xff]  ;;  %v1013_v13 = vld [vmem:[%s2142_s4 + $0x60] sm:$0xff]  ;;  %s1500_s9 = sshll.u32 %s1647_s21, 8 }
  0x16   : > { %s1755_s13 = scalar_lea.vmem %s2138_s0, %s1428_s10  ;;  %v1012_v14 = vld [vmem:[%s2142_s4 + $0x58] sm:$0xff]  ;;  %v1011_v16 = vld [vmem:[%s2142_s4 + $0x50] sm:$0xff]  ;;  %v1010_v17 = vld [vmem:[%s2142_s4 + $0x48] sm:$0xff]  ;;  %s1275_s12 = scalar_lea.hbm %s2143_s5, %s1500_s9 }
  0x17   : > { %v407_v1 = vld [vmem:[%s1755_s13] sm:$0xff]  ;;  %v1760_v2 = vld [vmem:[%s1755_s13 + $0x8] sm:$0xff]  ;;  %v1765_v3 = vld [vmem:[%s1755_s13 + $0x10] sm:$0xff]  ;;  %1018 = vmatpush.msra.mxu2 %v1015_v11  ;;  %s1278_s15 = sshll.u32 %s1275_s12, 4  ;;  %s1263_s21 = scalar_lea.sflag [#allocation5], %s303_s29  ;;  %s1279_s15 = int_to_ptr.hbm [resolvable:$true] %s1278_s15 }
  0x18   : > { %1463 = vmatmul.msk.f32.vlgmr.msra.gmra.mxu1 %vm472_vm1, %v407_v1  ;;  %v1770_v4 = vld [vmem:[%s1755_s13 + $0x18] sm:$0xff]  ;;  %v1775_v5 = vld [vmem:[%s1755_s13 + $0x20] sm:$0xff]  ;;  %v1780_v6 = vld [vmem:[%s1755_s13 + $0x28] sm:$0xff]  ;;  %s1591_s16 = sshra.s32 %s1279_s15, 4  ;;  %s1592_s16 = int_to_ptr.hbm [resolvable:$true] %s1591_s16 }
  0x19   : > { %v1785_v7 = vld [vmem:[%s1755_s13 + $0x30] sm:$0xff]  ;;  %v1790_v8 = vld [vmem:[%s1755_s13 + $0x38] sm:$0xff]  ;;  %v1798_v10 = vld [vmem:[%s1755_s13 + $0x40] sm:$0xff]  ;;  %1019 = vmatpush.msra.mxu2 %v1014_v12  ;;  %s1593_s17 = scalar_lea.hbm %s1592_s16, 256  ;;  %p1598_p1 = scmp.lt.s32.totalorder %s1592_s16, %s2143_s5 }
  0x1a   : > { %v1815_v15 = vld [vmem:[%s1755_s13 + $0x48] sm:$0xff]  ;;  %v1009_v18 = vld [vmem:[%s2142_s4 + $0x40] sm:$0xff]  ;;  %v1008_v19 = vld [vmem:[%s2142_s4 + $0x38] sm:$0xff]  ;;  %p1594_p12 = scmp.ne.s32.totalorder %s1592_s16, %s1593_s17 }
  0x1b   : > { %1020 = vmatpush.msra.mxu2 %v1013_v13  ;;  %v1832_v20 = vld [vmem:[%s1755_s13 + $0x50] sm:$0xff]  ;;  %v1006_v22 = vld [vmem:[%s2142_s4 + $0x28] sm:$0xff]  ;;  %v1005_v23 = vld [vmem:[%s2142_s4 + $0x20] sm:$0xff] }
  0x1c   : > { %v1007_v21 = vld [vmem:[%s2142_s4 + $0x30] sm:$0xff]  ;;  %v1004_v24 = vld [vmem:[%s2142_s4 + $0x18] sm:$0xff]  ;;  %v1002_v27 = vld [vmem:[%s2142_s4 + $0x8] sm:$0xff]  ;;  %p1595_p13 = pnand %p1594_p12, %p1729_p4 }
  0x1d   : > { %1021 = vmatpush.msra.mxu2 %v1012_v14  ;;  %v1849_v25 = vld [vmem:[%s1755_s13 + $0x58] sm:$0xff]  ;;  %v1003_v26 = vld [vmem:[%s2142_s4 + $0x10] sm:$0xff]  ;;  %v1001_v28 = vld [vmem:[%s2142_s4] sm:$0xff] }
  0x1e   : > { %v1863_v29 = vld [vmem:[%s1755_s13 + $0x60] sm:$0xff]  ;;  %v1876_v31 = vld [vmem:[%s1755_s13 + $0x68] sm:$0xff]  ;;  %v1885_v33 = vld [vmem:[%s1755_s13 + $0x70] sm:$0xff]  ;;  %p1596_p0 = pneg %p1595_p13 }
  0x1f   : > { %1022 = vmatpush.msra.mxu2 %v1011_v16  ;;  %v471_v30 = vld [vmem:[%s2139_s1] sm:$0xf]  ;;  %v432_v32 = vld [vmem:[%s1755_s13 + $0xc8] sm:$0xff]  ;;  %v433_v34 = vld [vmem:[%s1755_s13 + $0xd0] sm:$0xff] }
  0x20   : > { %1464 = vmatmul.msk.f32.gmra.mxu1 %vm472_vm1, %v1760_v2  ;;  %1429 = vmatpush.msk.msra.mxu0 %vm569_vm0, %v471_v30  ;;  %v1894_v35 = vld [vmem:[%s1755_s13 + $0x78] sm:$0xff]  ;;  %v1903_v38 = vld [vmem:[%s1755_s13 + $0x80] sm:$0xff]  ;;  %v1912_v41 = vld [vmem:[%s1755_s13 + $0x88] sm:$0xff] }
  0x21   : > { %1023 = vmatpush.msra.mxu2 %v1010_v17  ;;  %1501 = vmatpush.msk.msra.mxu3 %vm569_vm0, %v471_v30  ;;  %v434_v36 = vld [vmem:[%s1755_s13 + $0xd8] sm:$0xff]  ;;  %v435_v39 = vld [vmem:[%s1755_s13 + $0xe0] sm:$0xff]  ;;  %v436_v42 = vld [vmem:[%s1755_s13 + $0xe8] sm:$0xff] }
  0x22   : > { %1430 = vmatmul.msk.f32.vlgmr.msra.gmra.mxu0 %vm472_vm1, %v407_v1  ;;  %1455 = vmatmul.msk.f32.vlgmr.msra.gmra.mxu3 %vm472_vm1, %v432_v32  ;;  %v1921_v44 = vld [vmem:[%s1755_s13 + $0x90] sm:$0xff]  ;;  %v1930_v47 = vld [vmem:[%s1755_s13 + $0x98] sm:$0xff]  ;;  %v1939_v50 = vld [vmem:[%s1755_s13 + $0xa0] sm:$0xff] }
  0x23   : > { %1024 = vmatpush.msra.mxu2 %v1009_v18  ;;  %1502 = vmatpush.msk.msrb.mxu3 %vm569_vm0, %v1747_v0  ;;  %v437_v45 = vld [vmem:[%s1755_s13 + $0xf0] sm:$0xff]  ;;  %v438_v48 = vld [vmem:[%s1755_s13 + $0xf8] sm:$0xff]  ;;  %v1947_v52 = vld [vmem:[%s1755_s13 + $0xa8] sm:$0xff] }
  0x24   : > { %v1955_v54 = vld [vmem:[%s1755_s13 + $0xb0] sm:$0xff]  ;;  %v1963_v56 = vld [vmem:[%s1755_s13 + $0xb8] sm:$0xff]  ;;  %v1971_v58 = vld [vmem:[%s1755_s13 + $0xc0] sm:$0xff]  ;;  %s1597_s13 = scalar_lea.hbm %s2143_s5, 512 }
  0x25   : > { %1025 = vmatpush.msra.mxu2 %v1008_v19  ;;  %1503 = vmatpush.msra.mxu3 %v1016_v9  ;;  %p1599_p2 = scmp.lt.s32.totalorder %s1597_s13, %s1593_s17 }
  0x27   : > { %1026 = vmatpush.msra.mxu2 %v1007_v21  ;;  %1504 = vmatpush.msra.mxu3 %v1015_v11  ;;  %p1600_p3 = por %p1599_p2, %p1598_p1 }
  0x28   : > { %1465 = vmatmul.msk.f32.gmra.mxu1 %vm472_vm1, %v1765_v3 }
  0x29   : > { %1027 = vmatpush.msra.mxu2 %v1006_v22  ;;  %1505 = vmatpush.msra.mxu3 %v1014_v12  ;;  %p1601_p5 = pnand %p1600_p3, %p1596_p0 }
  0x2a   : > { %1431 = vmatmul.msk.f32.gmra.mxu0 %vm472_vm1, %v1760_v2  ;;  %1456 = vmatmul.msk.f32.gmra.mxu3 %vm472_vm1, %v433_v34 }
  0x2b   : > { %1028 = vmatpush.msra.mxu2 %v1005_v23  ;;  %1506 = vmatpush.msra.mxu3 %v1013_v13 }
  0x2d   : > { %1029 = vmatpush.msra.mxu2 %v1004_v24  ;;  %1507 = vmatpush.msra.mxu3 %v1012_v14 }
  0x2f   : > { %1030 = vmatpush.msra.mxu2 %v1003_v26  ;;  %1508 = vmatpush.msra.mxu3 %v1011_v16 }
  0x30   : > { %1466 = vmatmul.msk.f32.gmra.mxu1 %vm472_vm1, %v1770_v4 }
  0x31   : > { %1031 = vmatpush.msra.mxu2 %v1002_v27  ;;  %1509 = vmatpush.msra.mxu3 %v1010_v17 }
  0x32   : > { %1432 = vmatmul.msk.f32.gmra.mxu0 %vm472_vm1, %v1765_v3  ;;  %1457 = vmatmul.msk.f32.gmra.mxu3 %vm472_vm1, %v434_v36 }
  0x33   : > { %1032 = vmatpush.msra.mxu2 %v1001_v28  ;;  %1510 = vmatpush.msra.mxu3 %v1009_v18 }
  0x35   : > { %1511 = vmatpush.msra.mxu3 %v1008_v19 }
  0x37   : > { %1512 = vmatpush.msra.mxu3 %v1007_v21 }
  0x38   : > { %1467 = vmatmul.msk.f32.gmra.mxu1 %vm472_vm1, %v1775_v5 }
  0x39   : > { %1513 = vmatpush.msra.mxu3 %v1006_v22 }
  0x3a   : > { %1433 = vmatmul.msk.f32.gmra.mxu0 %vm472_vm1, %v1770_v4  ;;  %1458 = vmatmul.msk.f32.gmra.mxu3 %vm472_vm1, %v435_v39 }
  0x3b   : > { %1514 = vmatpush.msra.mxu3 %v1005_v23 }
  0x3d   : > { %1515 = vmatpush.msra.mxu3 %v1004_v24 }
  0x3f   : > { %1516 = vmatpush.msra.mxu3 %v1003_v26 }
  0x40   : > { %1468 = vmatmul.msk.f32.gmra.mxu1 %vm472_vm1, %v1780_v6 }
  0x41   : > { %1517 = vmatpush.msra.mxu3 %v1002_v27 }
  0x42   : > { %1434 = vmatmul.msk.f32.gmra.mxu0 %vm472_vm1, %v1775_v5  ;;  %1459 = vmatmul.msk.f32.gmra.mxu3 %vm472_vm1, %v436_v42 }
  0x43   : > { %1518 = vmatpush.msra.mxu3 %v1001_v28 }
  0x48   : > { %1469 = vmatmul.msk.f32.gmra.mxu1 %vm472_vm1, %v1785_v7 }
  0x4a   : > { %1435 = vmatmul.msk.f32.gmra.mxu0 %vm472_vm1, %v1780_v6  ;;  %1460 = vmatmul.msk.f32.gmra.mxu3 %vm472_vm1, %v437_v45 }
  0x50   : > { %1470 = vmatmul.msk.f32.gmra.mxu1 %vm472_vm1, %v1790_v8 }
  0x52   : > { %1436 = vmatmul.msk.f32.gmra.mxu0 %vm472_vm1, %v1785_v7  ;;  %1461 = vmatmul.msk.f32.gmra.mxu3 %vm472_vm1, %v438_v48  ;;  %v1997_v7 = vld [vmem:[%s2140_s2] ss:$0 sm:$0xff] }
  0x58   : > { %1471 = vmatmul.msk.f32.gmra.mxu1 %vm472_vm1, %v1798_v10 }
  0x5a   : > { %1437 = vmatmul.msk.f32.gmra.mxu0 %vm472_vm1, %v1790_v8  ;;  %1488 = vmatmul.msk.f32.vlgmr.msrb.gmra.mxu3 %vm472_vm1, %v432_v32 }
  0x60   : > { %1472 = vmatmul.msk.f32.gmra.mxu1 %vm472_vm1, %v1815_v15 }
  0x62   : > { %1438 = vmatmul.msk.f32.gmra.mxu0 %vm472_vm1, %v1798_v10  ;;  %1489 = vmatmul.msk.f32.gmra.mxu3 %vm472_vm1, %v433_v34 }
  0x68   : > { %1473 = vmatmul.msk.f32.gmra.mxu1 %vm472_vm1, %v1832_v20 }
  0x6a   : > { %1439 = vmatmul.msk.f32.gmra.mxu0 %vm472_vm1, %v1815_v15  ;;  %1490 = vmatmul.msk.f32.gmra.mxu3 %vm472_vm1, %v434_v36 }
  0x70   : > { %1474 = vmatmul.msk.f32.gmra.mxu1 %vm472_vm1, %v1849_v25 }
  0x72   : > { %1440 = vmatmul.msk.f32.gmra.mxu0 %vm472_vm1, %v1832_v20  ;;  %1491 = vmatmul.msk.f32.gmra.mxu3 %vm472_vm1, %v435_v39 }
  0x78   : > { %1475 = vmatmul.msk.f32.gmra.mxu1 %vm472_vm1, %v1863_v29 }
  0x7a   : > { %1441 = vmatmul.msk.f32.gmra.mxu0 %vm472_vm1, %v1849_v25  ;;  %1492 = vmatmul.msk.f32.gmra.mxu3 %vm472_vm1, %v436_v42 }
  0x80   : > { %1476 = vmatmul.msk.f32.gmra.mxu1 %vm472_vm1, %v1876_v31 }
  0x82   : > { %1442 = vmatmul.msk.f32.gmra.mxu0 %vm472_vm1, %v1863_v29  ;;  %1493 = vmatmul.msk.f32.gmra.mxu3 %vm472_vm1, %v437_v45 }
  0x88   : > { %1477 = vmatmul.msk.f32.gmra.mxu1 %vm472_vm1, %v1885_v33 }
  0x8a   : > { %1443 = vmatmul.msk.f32.gmra.mxu0 %vm472_vm1, %v1876_v31  ;;  %1494 = vmatmul.msk.f32.gmra.mxu3 %vm472_vm1, %v438_v48 }
  0x90   : > { %1478 = vmatmul.msk.f32.gmra.mxu1 %vm472_vm1, %v1894_v35 }
  0x92   : > { %1444 = vmatmul.msk.f32.gmra.mxu0 %vm472_vm1, %v1885_v33 }
  0x95   : > { %v806_v37 = vpop.f32.mrf.mxu1 }
  0x96   : > { %1033 = vmatmul.f32.vlgmr.msra.gmra.mxu2 %v806_v37 }
  0x98   : > { %1479 = vmatmul.msk.f32.gmra.mxu1 %vm472_vm1, %v1903_v38 }
  0x9a   : > { %1445 = vmatmul.msk.f32.gmra.mxu0 %vm472_vm1, %v1894_v35 }
  0x9d   : > { %v809_v40 = vpop.f32.mrf.mxu1 }
  0x9e   : > { %1036 = vmatmul.f32.gmra.mxu2 %v809_v40 }
  0x9f   : > { %v590_v63 = vpop.f32.mrf.mxu0 }
  0xa0   : > { %1480 = vmatmul.msk.f32.gmra.mxu1 %vm472_vm1, %v1912_v41  ;;  %v1166_v10 = vadd.f32 %v1997_v7, %v590_v63 }
  0xa2   : > { %1446 = vmatmul.msk.f32.gmra.mxu0 %vm472_vm1, %v1903_v38 }
  0xa5   : > { %v812_v43 = vpop.f32.mrf.mxu1  ;;  %v1990_v4 = vpop.f32.mrf.mxu3 }
  0xa6   : > { %1039 = vmatmul.f32.gmra.mxu2 %v812_v43 }
  0xa7   : > { %v593_v1 = vpop.f32.mrf.mxu0 }
  0xa8   : > { %1481 = vmatmul.msk.f32.gmra.mxu1 %vm472_vm1, %v1921_v44  ;;  %v1167_v16 = vadd.f32 %v1997_v7, %v593_v1 }
  0xaa   : > { %1447 = vmatmul.msk.f32.gmra.mxu0 %vm472_vm1, %v1912_v41 }
  0xad   : > { %v815_v46 = vpop.f32.mrf.mxu1  ;;  %v2002_v8 = vpop.f32.mrf.mxu3 }
  0xae   : > { %1042 = vmatmul.f32.gmra.mxu2 %v815_v46 }
  0xaf   : > { %v596_v3 = vpop.f32.mrf.mxu0 }
  0xb0   : > { %1482 = vmatmul.msk.f32.gmra.mxu1 %vm472_vm1, %v1930_v47  ;;  %v1168_v21 = vadd.f32 %v1997_v7, %v596_v3 }
  0xb2   : > { %1448 = vmatmul.msk.f32.gmra.mxu0 %vm472_vm1, %v1921_v44 }
  0xb5   : > { %v818_v49 = vpop.f32.mrf.mxu1  ;;  %v2012_v15 = vpop.f32.mrf.mxu3 }
  0xb6   : > { %1045 = vmatmul.f32.gmra.mxu2 %v818_v49 }
  0xb7   : > { %v599_v6 = vpop.f32.mrf.mxu0 }
  0xb8   : > { %1483 = vmatmul.msk.f32.gmra.mxu1 %vm472_vm1, %v1939_v50  ;;  %v1169_v27 = vadd.f32 %v1997_v7, %v599_v6 }
  0xba   : > { %1449 = vmatmul.msk.f32.gmra.mxu0 %vm472_vm1, %v1930_v47 }
  0xbd   : > { %v821_v51 = vpop.f32.mrf.mxu1  ;;  %v2019_v22 = vpop.f32.mrf.mxu3 }
  0xbe   : > { %1048 = vmatmul.f32.gmra.mxu2 %v821_v51 }
  0xbf   : > { %v602_v11 = vpop.f32.mrf.mxu0 }
  0xc0   : > { %1484 = vmatmul.msk.f32.gmra.mxu1 %vm472_vm1, %v1947_v52  ;;  %v1170_v33 = vadd.f32 %v1997_v7, %v602_v11 }
  0xc2   : > { %1450 = vmatmul.msk.f32.gmra.mxu0 %vm472_vm1, %v1939_v50 }
  0xc5   : > { %v824_v53 = vpop.f32.mrf.mxu1  ;;  %v2025_v30 = vpop.f32.mrf.mxu3 }
  0xc6   : > { %1051 = vmatmul.f32.gmra.mxu2 %v824_v53 }
  0xc7   : > { %v605_v17 = vpop.f32.mrf.mxu0 }
  0xc8   : > { %1485 = vmatmul.msk.f32.gmra.mxu1 %vm472_vm1, %v1955_v54  ;;  %v1171_v39 = vadd.f32 %v1997_v7, %v605_v17 }
  0xca   : > { %1451 = vmatmul.msk.f32.gmra.mxu0 %vm472_vm1, %v1947_v52 }
  0xcd   : > { %v827_v55 = vpop.f32.mrf.mxu1  ;;  %v2033_v37 = vpop.f32.mrf.mxu3 }
  0xce   : > { %1054 = vmatmul.f32.gmra.mxu2 %v827_v55 }
  0xcf   : > { %v608_v23 = vpop.f32.mrf.mxu0 }
  0xd0   : > { %1486 = vmatmul.msk.f32.gmra.mxu1 %vm472_vm1, %v1963_v56  ;;  %v1172_v45 = vadd.f32 %v1997_v7, %v608_v23 }
  0xd2   : > { %1452 = vmatmul.msk.f32.gmra.mxu0 %vm472_vm1, %v1955_v54 }
  0xd5   : > { %v830_v57 = vpop.f32.mrf.mxu1  ;;  %v2038_v44 = vpop.f32.mrf.mxu3 }
  0xd6   : > { %1057 = vmatmul.f32.gmra.mxu2 %v830_v57 }
  0xd7   : > { %v611_v28 = vpop.f32.mrf.mxu0 }
  0xd8   : > { %1487 = vmatmul.msk.f32.gmra.mxu1 %vm472_vm1, %v1971_v58  ;;  %v1173_v50 = vadd.f32 %v1997_v7, %v611_v28 }
  0xda   : > { %1453 = vmatmul.msk.f32.gmra.mxu0 %vm472_vm1, %v1963_v56 }
  0xdd   : > { %v833_v59 = vpop.f32.mrf.mxu1  ;;  %v881_v51 = vpop.f32.mrf.mxu3 }
  0xde   : > { %1060 = vmatmul.f32.gmra.mxu2 %v833_v59 }
  0xdf   : > { %v614_v34 = vpop.f32.mrf.mxu0 }
  0xe0   : > { %v1174_v56 = vadd.f32 %v1997_v7, %v614_v34 }
  0xe2   : > { %1454 = vmatmul.msk.f32.gmra.mxu0 %vm472_vm1, %v1971_v58 }
  0xe5   : > { %v836_v60 = vpop.f32.mrf.mxu1  ;;  %v884_v58 = vpop.f32.mrf.mxu3 }
  0xe6   : > { %1063 = vmatmul.f32.gmra.mxu2 %v836_v60 }
  0xe7   : > { %v617_v40 = vpop.f32.mrf.mxu0 }
  0xed   : > { %v839_v61 = vpop.f32.mrf.mxu1 }
  0xee   : > { %1066 = vmatmul.f32.gmra.mxu2 %v839_v61  ;;  %v1175_v61 = vadd.f32 %v1997_v7, %v617_v40 }
  0xef   : > { %v620_v46 = vpop.f32.mrf.mxu0 }
  0xf5   : > { %v842_v62 = vpop.f32.mrf.mxu1 }
  0xf6   : > { %1069 = vmatmul.f32.gmra.mxu2 %v842_v62 }
  0xf7   : > { %v623_v53 = vpop.f32.mrf.mxu0 }
  0xfd   : > { %v845_v0 = vpop.f32.mrf.mxu1 }
  0xfe   : > { %1072 = vmatmul.f32.gmra.mxu2 %v845_v0  ;;  %v887_v0 = vpop.f32.mrf.mxu3 }
  0xff   : > { %v626_v60 = vpop.f32.mrf.mxu0 }
 0x105   : > { %v848_v2 = vpop.f32.mrf.mxu1 }
 0x106   : > { %1075 = vmatmul.f32.gmra.mxu2 %v848_v2  ;;  %v1176_v2 = vadd.f32 %v1997_v7, %v620_v46  ;;  %v890_v6 = vpop.f32.mrf.mxu3 }
 0x107   : > { %v629_v1 = vpop.f32.mrf.mxu0 }
 0x10d   : > { %v851_v5 = vpop.f32.mrf.mxu1 }
 0x10e   : > { %1078 = vmatmul.f32.gmra.mxu2 %v851_v5 }
 0x115   : > { %v854_v9 = vpop.f32.mrf.mxu1 }
 0x116   : > { %1081 = vmatmul.f32.gmra.mxu2 %v854_v9  ;;  %v1177_v9 = vadd.f32 %v1997_v7, %v623_v53 }
 0x119   : > { %v1034_v12 = vpop.f32.mrf.mxu2 }
 0x11a   : > { %v1198_v13 = vadd.f32 %v1166_v10, %v1034_v12  ;;  %v632_v10 = vpop.f32.mrf.mxu0 }
 0x11c   : > { %1230 = vst [vmem:[%s2009_s8] sm:$0xff] %v1198_v13  ;;  %v1178_v13 = vadd.f32 %v1997_v7, %v626_v60 }
 0x11d   : > { %v857_v14 = vpop.f32.mrf.mxu1 }
 0x11e   : > { %1084 = vmatmul.f32.gmra.mxu2 %v857_v14  ;;  %v893_v14 = vpop.f32.mrf.mxu3 }
 0x121   : > { %v1037_v18 = vpop.f32.mrf.mxu2 }
 0x122   : > { %v1199_v19 = vadd.f32 %v1167_v16, %v1037_v18  ;;  %v635_v17 = vpop.f32.mrf.mxu0 }
 0x124   : > { %1231 = vst [vmem:[%s2009_s8 + $0x8] sm:$0xff] %v1199_v19  ;;  %v1179_v19 = vadd.f32 %v1997_v7, %v629_v1 }
 0x125   : > { %v860_v20 = vpop.f32.mrf.mxu1 }
 0x126   : > { %1087 = vmatmul.f32.gmra.mxu2 %v860_v20 }
 0x129   : > { %v1040_v24 = vpop.f32.mrf.mxu2 }
 0x12a   : > { %v1200_v25 = vadd.f32 %v1168_v21, %v1040_v24  ;;  %v896_v21 = vpop.f32.mrf.mxu3  ;;  %v638_v24 = vpop.f32.mrf.mxu0 }
 0x12b   : > { %v1182_v34 = vadd.f32 %v1997_v7, %v638_v24 }
 0x12c   : > { %1232 = vst [vmem:[%s2009_s8 + $0x10] sm:$0xff] %v1200_v25  ;;  %v1180_v25 = vadd.f32 %v1997_v7, %v632_v10 }
 0x12d   : > { %v863_v26 = vpop.f32.mrf.mxu1 }
 0x12e   : > { %1090 = vmatmul.f32.gmra.mxu2 %v863_v26 }
 0x131   : > { %v1043_v29 = vpop.f32.mrf.mxu2 }
 0x132   : > { %v1201_v31 = vadd.f32 %v1169_v27, %v1043_v29  ;;  %v899_v28 = vpop.f32.mrf.mxu3  ;;  %v641_v29 = vpop.f32.mrf.mxu0 }
 0x134   : > { %1233 = vst [vmem:[%s2009_s8 + $0x18] sm:$0xff] %v1201_v31  ;;  %v1181_v31 = vadd.f32 %v1997_v7, %v635_v17 }
 0x135   : > { %v866_v32 = vpop.f32.mrf.mxu1 }
 0x136   : > { %1093 = vmatmul.f32.gmra.mxu2 %v866_v32 }
 0x139   : > { %v1046_v35 = vpop.f32.mrf.mxu2 }
 0x13a   : > { %v1202_v36 = vadd.f32 %v1170_v33, %v1046_v35  ;;  %v644_v35 = vpop.f32.mrf.mxu0 }
 0x13c   : > { %1234 = vst [vmem:[%s2009_s8 + $0x20] sm:$0xff] %v1202_v36 }
 0x13d   : > { %v869_v38 = vpop.f32.mrf.mxu1 }
 0x13e   : > { %1096 = vmatmul.f32.gmra.mxu2 %v869_v38 }
 0x141   : > { %v1049_v41 = vpop.f32.mrf.mxu2 }
 0x142   : > { %v1203_v42 = vadd.f32 %v1171_v39, %v1049_v41  ;;  %v1183_v39 = vadd.f32 %v1997_v7, %v641_v29  ;;  %v647_v41 = vpop.f32.mrf.mxu0 }
 0x144   : > { %1235 = vst [vmem:[%s2009_s8 + $0x28] sm:$0xff] %v1203_v42 }
 0x145   : > { %v872_v43 = vpop.f32.mrf.mxu1 }
 0x146   : > { %1099 = vmatmul.f32.vlgmr.msra.gmra.mxu3 %v872_v43  ;;  %v1184_v43 = vadd.f32 %v1997_v7, %v644_v35 }
 0x149   : > { %v1052_v47 = vpop.f32.mrf.mxu2 }
 0x14a   : > { %v1204_v48 = vadd.f32 %v1172_v45, %v1052_v47  ;;  %v650_v47 = vpop.f32.mrf.mxu0 }
 0x14c   : > { %1236 = vst [vmem:[%s2009_s8 + $0x30] sm:$0xff] %v1204_v48  ;;  %v1185_v48 = vadd.f32 %v1997_v7, %v647_v41 }
 0x14d   : > { %v875_v49 = vpop.f32.mrf.mxu1 }
 0x14e   : > { %1102 = vmatmul.f32.gmra.mxu3 %v875_v49 }
 0x151   : > { %v1055_v52 = vpop.f32.mrf.mxu2 }
 0x152   : > { %v1205_v54 = vadd.f32 %v1173_v50, %v1055_v52  ;;  %v1186_v52 = vadd.f32 %v1997_v7, %v650_v47 }
 0x154   : > { %1237 = vst [vmem:[%s2009_s8 + $0x38] sm:$0xff] %v1205_v54 }
 0x155   : > { %v878_v55 = vpop.f32.mrf.mxu1 }
 0x156   : > { %1105 = vmatmul.f32.gmra.mxu3 %v878_v55 }
 0x159   : > { %v1058_v57 = vpop.f32.mrf.mxu2 }
 0x15a   : > { %v1206_v59 = vadd.f32 %v1174_v56, %v1058_v57 }
 0x15c   : > { %1238 = vst [vmem:[%s2009_s8 + $0x40] sm:$0xff] %v1206_v59 }
 0x15e   : > { %1108 = vmatmul.f32.gmra.mxu3 %v881_v51  ;;  %v653_v51 = vpop.f32.mrf.mxu0 }
 0x15f   : > { %v1187_v55 = vadd.f32 %v1997_v7, %v653_v51 }
 0x161   : > { %v1061_v62 = vpop.f32.mrf.mxu2 }
 0x162   : > { %v1207_v63 = vadd.f32 %v1175_v61, %v1061_v62 }
 0x164   : > { %1239 = vst [vmem:[%s2009_s8 + $0x48] sm:$0xff] %v1207_v63 }
 0x166   : > { %1111 = vmatmul.f32.gmra.mxu3 %v884_v58  ;;  %v656_v56 = vpop.f32.mrf.mxu0 }
 0x167   : > { %v1188_v59 = vadd.f32 %v1997_v7, %v656_v56 }
 0x169   : > { %v1064_v3 = vpop.f32.mrf.mxu2 }
 0x16a   : > { %v1208_v5 = vadd.f32 %v1176_v2, %v1064_v3 }
 0x16c   : > { %1240 = vst [vmem:[%s2009_s8 + $0x50] sm:$0xff] %v1208_v5 }
 0x16e   : > { %1114 = vmatmul.f32.gmra.mxu3 %v887_v0  ;;  %v659_v61 = vpop.f32.mrf.mxu0 }
 0x16f   : > { %v1189_v63 = vadd.f32 %v1997_v7, %v659_v61 }
 0x171   : > { %v1067_v11 = vpop.f32.mrf.mxu2 }
 0x172   : > { %v1209_v12 = vadd.f32 %v1177_v9, %v1067_v11  ;;  %v1191_v9 = vadd.f32 %v1997_v7, %v1990_v4  ;;  %v1194_v4 = vadd.f32 %v1997_v7, %v2019_v22  ;;  %v1197_v22 = vadd.f32 %v1997_v7, %v2038_v44 }
 0x174   : > { %1241 = vst [vmem:[%s2009_s8 + $0x58] sm:$0xff] %v1209_v12  ;;  %v1192_v12 = vadd.f32 %v1997_v7, %v2002_v8  ;;  %v1195_v8 = vadd.f32 %v1997_v7, %v2025_v30 }
 0x176   : > { %1117 = vmatmul.f32.gmra.mxu3 %v890_v6  ;;  %v662_v2 = vpop.f32.mrf.mxu0 }
 0x177   : > { %v1190_v3 = vadd.f32 %v1997_v7, %v662_v2 }
 0x179   : > { %v1070_v16 = vpop.f32.mrf.mxu2 }
 0x17a   : > { %v1210_v18 = vadd.f32 %v1178_v13, %v1070_v16  ;;  %v1193_v16 = vadd.f32 %v1997_v7, %v2012_v15  ;;  %v1196_v15 = vadd.f32 %v1997_v7, %v2033_v37 }
 0x17c   : > { %1242 = vst [vmem:[%s2009_s8 + $0x60] sm:$0xff] %v1210_v18 }
 0x17e   : > { %1120 = vmatmul.f32.gmra.mxu3 %v893_v14 }
 0x181   : > { %v1073_v20 = vpop.f32.mrf.mxu2 }
 0x182   : > { %v1211_v23 = vadd.f32 %v1179_v19, %v1073_v20 }
 0x184   : > { %1243 = vst [vmem:[%s2009_s8 + $0x68] sm:$0xff] %v1211_v23 }
 0x186   : > { %1123 = vmatmul.f32.gmra.mxu3 %v896_v21 }
 0x189   : > { %v1076_v26 = vpop.f32.mrf.mxu2 }
 0x18a   : > { %v1212_v27 = vadd.f32 %v1180_v25, %v1076_v26 }
 0x18c   : > { %1244 = vst [vmem:[%s2009_s8 + $0x70] sm:$0xff] %v1212_v27 }
 0x18e   : > { %1126 = vmatmul.f32.gmra.mxu3 %v899_v28 }
 0x191   : > { %v1079_v32 = vpop.f32.mrf.mxu2 }
 0x192   : > { %v1213_v33 = vadd.f32 %v1181_v31, %v1079_v32 }
 0x194   : > { %1245 = vst [vmem:[%s2009_s8 + $0x78] sm:$0xff] %v1213_v33 }
 0x199   : > { %v1082_v36 = vpop.f32.mrf.mxu2 }
 0x19a   : > { %v1214_v38 = vadd.f32 %v1182_v34, %v1082_v36 }
 0x19c   : > { %1246 = vst [vmem:[%s2009_s8 + $0x80] sm:$0xff] %v1214_v38 }
 0x1a1   : > { %v1085_v40 = vpop.f32.mrf.mxu2 }
 0x1a2   : > { %v1215_v42 = vadd.f32 %v1183_v39, %v1085_v40 }
 0x1a4   : > { %1247 = vst [vmem:[%s2009_s8 + $0x88] sm:$0xff] %v1215_v42 }
 0x1a9   : > { %v1088_v45 = vpop.f32.mrf.mxu2 }
 0x1aa   : > { %v1216_v46 = vadd.f32 %v1184_v43, %v1088_v45 }
 0x1ac   : > { %1248 = vst [vmem:[%s2009_s8 + $0x90] sm:$0xff] %v1216_v46 }
 0x1b1   : > { %v1091_v49 = vpop.f32.mrf.mxu2 }
 0x1b2   : > { %v1217_v50 = vadd.f32 %v1185_v48, %v1091_v49 }
 0x1b4   : > { %1249 = vst [vmem:[%s2009_s8 + $0x98] sm:$0xff] %v1217_v50 }
 0x1b9   : > { %v1094_v53 = vpop.f32.mrf.mxu2 }
 0x1ba   : > { %v1218_v54 = vadd.f32 %v1186_v52, %v1094_v53 }
 0x1bc   : > { %1250 = vst [vmem:[%s2009_s8 + $0xa0] sm:$0xff] %v1218_v54 }
 0x1c1   : > { %v1097_v57 = vpop.f32.mrf.mxu2 }
 0x1c2   : > { %v1219_v58 = vadd.f32 %v1187_v55, %v1097_v57 }
 0x1c4   : > { %1251 = vst [vmem:[%s2009_s8 + $0xa8] sm:$0xff] %v1219_v58 }
 0x1c9   : > { %v1100_v60 = vpop.f32.mrf.mxu3 }
 0x1ca   : > { %v1220_v62 = vadd.f32 %v1188_v59, %v1100_v60 }
 0x1cc   : > { %1252 = vst [vmem:[%s2009_s8 + $0xb0] sm:$0xff] %v1220_v62 }
 0x1d1   : > { %v1103_v0 = vpop.f32.mrf.mxu3 }
 0x1d2   : > { %v1221_v1 = vadd.f32 %v1189_v63, %v1103_v0 }
 0x1d4   : > { %1253 = vst [vmem:[%s2009_s8 + $0xb8] sm:$0xff] %v1221_v1 }
 0x1d9   : > { %v1106_v5 = vpop.f32.mrf.mxu3 }
 0x1da   : > { %v1222_v6 = vadd.f32 %v1190_v3, %v1106_v5 }
 0x1dc   : > { %1254 = vst [vmem:[%s2009_s8 + $0xc0] sm:$0xff] %v1222_v6 }
 0x1e1   : > { %v1109_v10 = vpop.f32.mrf.mxu3 }
 0x1e2   : > { %v1223_v11 = vadd.f32 %v1191_v9, %v1109_v10 }
 0x1e4   : > { %1255 = vst [vmem:[%s2009_s8 + $0xc8] sm:$0xff] %v1223_v11 }
 0x1e9   : > { %v1112_v13 = vpop.f32.mrf.mxu3 }
 0x1ea   : > { %v1224_v14 = vadd.f32 %v1192_v12, %v1112_v13 }
 0x1ec   : > { %1256 = vst [vmem:[%s2009_s8 + $0xd0] sm:$0xff] %v1224_v14 }
 0x1f1   : > { %v1115_v17 = vpop.f32.mrf.mxu3 }
 0x1f2   : > { %v1225_v18 = vadd.f32 %v1193_v16, %v1115_v17 }
 0x1f4   : > { %1257 = vst [vmem:[%s2009_s8 + $0xd8] sm:$0xff] %v1225_v18 }
 0x1f9   : > { %v1118_v19 = vpop.f32.mrf.mxu3 }
 0x1fa   : > { %v1226_v20 = vadd.f32 %v1194_v4, %v1118_v19 }
 0x1fc   : > { %1258 = vst [vmem:[%s2009_s8 + $0xe0] sm:$0xff] %v1226_v20 }
 0x201   : > { %v1121_v21 = vpop.f32.mrf.mxu3 }
 0x202   : > { %v1227_v23 = vadd.f32 %v1195_v8, %v1121_v21 }
 0x204   : > { %1259 = vst [vmem:[%s2009_s8 + $0xe8] sm:$0xff] %v1227_v23 }
 0x209   : > { %v1124_v24 = vpop.f32.mrf.mxu3 }
 0x20a   : > { %v1228_v25 = vadd.f32 %v1196_v15, %v1124_v24 }
 0x20c   : > { %1260 = vst [vmem:[%s2009_s8 + $0xf0] sm:$0xff] %v1228_v25 }
 0x211   : > { %v1127_v30 = vpop.f32.mrf.mxu3 }
 0x212   : > { %v1229_v26 = vadd.f32 %v1197_v22, %v1127_v30 }
 0x214   : > { %1261 = vst [vmem:[%s2009_s8 + $0xf8] sm:$0xff] %v1229_v26 }
 0x215   : > { %1604 = shalt.err (!%p1601_p5)
}
 0x216   : > { %s1657_s29 = smov 128   ;;  %s1658_s8 = smov 8  }
 0x217   : > { %1519 = dma.vmem_to_hbm [thread:$0]  (%p1729_p4), %s1277_s14, 4096, %s1279_s15, %s1263_s21, %s1657_s29, %s1657_s29, %s1658_s8  }
 0x218 PF: > { %p1525_p6 = scmp.ge.s32.totalorder %s1655_s23, 2  ;;  %s1293_s9 = sand.u32 1, %s1635_s18  }
 0x219   : > { %s1294_s10 = scalar_lea.sflag [#allocation5], %s1293_s9 }
 0x21a   : > { %p1522_p7 = pnand %p1525_p6, %p1736_p8 }
 0x21c   : > { %p1523_p9 = pneg %p1522_p7 }
 0x21e   : > { %1630 = dma.done.wait (%p1523_p9), %s1294_s10, 4096  }
 0x21f   : > { %1632 = vsyncadd (%p1523_p9), %s1294_s10, 4294963200  ;;  %s18_s23 = sadd.s32 1, %s1655_s23   ;;  %s2146_s18 = smov %s1639_s19 }
 0x220   : > { %p15_p10 = scmp.ge.s32.totalorder %s18_s23, 4   ;;  %s2147_s19 = smov %s1643_s20 }
 0x221   : > { %s2148_s20 = smov %s1742_s6  ;;  %s2149_s21 = smov %s1651_s22 }
 0x222   : > { %s2150_s22 = smov %s2152_s26  ;;  %17 = sbr.rel (!%p15_p10) target bundleno = 4 (0x4), region = 103 }
 0x227   :  { %1300 = vsyncpa [#allocation5], 1 }
 0x228   :  { %1302 = vsyncpa [#allocation5 + $0x1], 1 }

</bundles_post_ra>
